<compile_context>
chip_gen: v7x
topology: tpu7x:2x2x1
jax: 0.10.0
libtpu: 0.0.40
codegen_flags: <defaults>
</compile_context>

<pallas_src>
import jax
import jax.numpy as jnp
from jax.experimental import pallas as pl
from jax.experimental.pallas import tpu as pltpu


def _detector_head_kernel(x_ref, w_ref, b_ref, o_ref):
    """GEMV tile: o[0, :] = sum_k x[:, k] * w[0, k] + bias.

    x_ref: (TB, K)  activation tile (VMEM), any float dtype
    w_ref: (1, K)   weight row (VMEM, resident across grid steps)
    b_ref: (1,)     bias scalar (SMEM)
    o_ref: (1, TB)  lane-dense output slab (f32)
    """
    x = x_ref[...].astype(jnp.float32)          # VPU cast (free if already f32)
    w = w_ref[...].astype(jnp.float32)          # (1, K) broadcasts over sublanes
    acc = jnp.sum(x * w, axis=-1)               # VPU mul + XLU lane reduce -> (TB,)
    o_ref[...] = (acc + b_ref[0])[None, :].astype(o_ref.dtype)


def simple_detector_head(x, weight, bias, *, batch_tile=1024):
    """Pallas forward for SimpleDetectorHead.

    x:      (B, num_patches, input_dim)  backbone tokens (f32 or bf16)
    weight: (1, num_patches*input_dim)   nn.Linear weight (num_classes == 1)
    bias:   (1,)                         nn.Linear bias
    returns (B,) f32 logits  == fc(flatten(x)).squeeze(-1)
    """
    assert weight.shape[0] == 1, "GEMV path implements num_classes == 1"
    # TODO(synk): for num_classes > 1, switch to an MXU matmul with the output
    # N dimension padded to >=128 (256 on v6e/v7x) instead of this GEMV path.

    B = x.shape[0]
    K = weight.shape[1]
    xf = x.reshape(B, K)                         # flatten(start_dim=1): layout no-op

    # Tile over batch only; weight stays VMEM-resident across grid steps.
    if B <= batch_tile:
        tb, b_pad = B, B                         # single block, no pipelining needed
    else:
        tb = batch_tile                          # multiple of 8 (sublane) & 128 (lane)
        b_pad = pl.cdiv(B, tb) * tb
        xf = jnp.pad(xf, ((0, b_pad - B), (0, 0)))
    num_tiles = b_pad // tb

    out = pl.pallas_call(
        _detector_head_kernel,
        out_shape=jax.ShapeDtypeStruct((1, b_pad), jnp.float32),
        grid_spec=pltpu.PrefetchScalarGridSpec(
            num_scalar_prefetch=0,
            grid=(num_tiles,),
            in_specs=[
                pl.BlockSpec((tb, K), lambda i: (i, 0)),              # x stream
                pl.BlockSpec((1, K), lambda i: (0, 0)),               # resident weight
                pl.BlockSpec(memory_space=pltpu.MemorySpace.SMEM),    # bias scalar
            ],
            out_specs=pl.BlockSpec((1, tb), lambda i: (0, i)),        # lane-dense out
        ),
        compiler_params=pltpu.CompilerParams(
            # Batch axis is fully parallel -> shards across v7x's 2 TensorCores,
            # harmless on single-TC v5e/v6e.
            dimension_semantics=("parallel",),
            # Explicit budget: 2 x 4 MiB x-buffers + weight/out << 32 MiB on all gens
            # (respects v7x's 64 MiB physical VMEM and v5e's small scoped default).
            vmem_limit_bytes=32 * 1024 * 1024,
        ),
    )(xf, weight, bias)

    return out[0, :B]                            # squeeze(-1) of the (B, 1) logits


if __name__ == "__main__":
    key = jax.random.PRNGKey(0)
    kx, kw, kb = jax.random.split(key, 3)

    # Module defaults: input_dim=64, img_size=32, patch_size=8 -> num_patches=16, K=1024
    B, num_patches, input_dim = 4, 16, 64
    K = num_patches * input_dim

    x = jax.random.normal(kx, (B, num_patches, input_dim), dtype=jnp.float32)
    weight = jax.random.normal(kw, (1, K), dtype=jnp.float32) * (1.0 / K**0.5)
    bias = jax.random.normal(kb, (1,), dtype=jnp.float32)

    out = jax.block_until_ready(simple_detector_head(x, weight, bias))

    # Pure-JAX reference: flatten -> Linear -> squeeze(-1)
    ref = (x.reshape(B, K) @ weight.T + bias)[:, 0]
    assert out.shape == (B,), out.shape
    assert jnp.allclose(out, ref, atol=1e-3, rtol=1e-3), (out, ref)
    print("KERNEL_OK")
</pallas_src>

<mosaic_0001>
module attributes {stable_mosaic.version = 11 : i64} {
  func.func @_detector_head_kernel(%arg0: i32, %arg1: memref<4x1024xf32, #tpu.memory_space<vmem>>, %arg2: memref<1x1024xf32, #tpu.memory_space<vmem>>, %arg3: memref<1xf32, #tpu.memory_space<smem>>, %arg4: memref<1x4xf32, #tpu.memory_space<vmem>>) attributes {dimension_semantics = [#tpu.dimension_semantics<parallel>], iteration_bounds = array<i64: 1>, scalar_prefetch = 0 : i64, scratch_operands = 0 : i64, tpu.core_type = #tpu.core_type<tc>, window_params = [{transform_indices = @transform_0, window_bounds = array<i64: 4, 1024>}, {pipeline_mode = #tpu.pipeline_mode<synchronous>, transform_indices = @transform_1, window_bounds = array<i64: 1, 1024>}, {transform_indices = @transform_2, window_bounds = array<i64: 1>}, {transform_indices = @transform_3, window_bounds = array<i64: 1, 4>}]} {
    %c0 = arith.constant 0 : index
    %c0_0 = arith.constant 0 : index
    %0 = vector.load %arg1[%c0, %c0_0] : memref<4x1024xf32, #tpu.memory_space<vmem>>, vector<4x1024xf32>
    %c0_1 = arith.constant 0 : index
    %c0_2 = arith.constant 0 : index
    %1 = vector.load %arg2[%c0_1, %c0_2] : memref<1x1024xf32, #tpu.memory_space<vmem>>, vector<1x1024xf32>
    %2 = vector.broadcast %1 : vector<1x1024xf32> to vector<4x1024xf32>
    %3 = arith.mulf %0, %2 : vector<4x1024xf32>
    %cst = arith.constant dense<0.000000e+00> : vector<4xf32>
    %4 = vector.multi_reduction <add>, %3, %cst [1] : vector<4x1024xf32> to vector<4xf32>
    %c0_3 = arith.constant 0 : index
    %5 = memref.load %arg3[%c0_3] : memref<1xf32, #tpu.memory_space<smem>>
    %6 = vector.broadcast %5 : f32 to vector<4xf32>
    %7 = arith.addf %4, %6 : vector<4xf32>
    %8 = vector.shape_cast %7 : vector<4xf32> to vector<1x4xf32>
    %c0_4 = arith.constant 0 : index
    %c0_5 = arith.constant 0 : index
    %9 = vector.load %arg4[%c0_4, %c0_5] : memref<1x4xf32, #tpu.memory_space<vmem>>, vector<1x4xf32>
    tpu.vector_store %arg4[%c0_4, %c0_5], %8 {strides = array<i32>} : memref<1x4xf32, #tpu.memory_space<vmem>>, vector<1x4xf32>,
    return
  }
  func.func @transform_0(%arg0: i32) -> (i32, i32) {
    %c0_i32 = arith.constant 0 : i32
    %c0_i32_0 = arith.constant 0 : i32
    return %arg0, %c0_i32 : i32, i32
  }
  func.func @transform_1(%arg0: i32) -> (i32, i32) {
    %c0_i32 = arith.constant 0 : i32
    %c0_i32_0 = arith.constant 0 : i32
    %c0_i32_1 = arith.constant 0 : i32
    return %c0_i32, %c0_i32_0 : i32, i32
  }
  func.func @transform_2(%arg0: i32) -> i32 {
    %c0_i32 = arith.constant 0 : i32
    %c0_i32_0 = arith.constant 0 : i32
    return %c0_i32 : i32
  }
  func.func @transform_3(%arg0: i32) -> (i32, i32) {
    %c0_i32 = arith.constant 0 : i32
    %c0_i32_0 = arith.constant 0 : i32
    return %c0_i32, %arg0 : i32, i32
  }
}

</mosaic_0001>

<bundles_post_ra>
// kernel: tpu_custom_call.1
= control target key start
LH: loop header
LB: loop body
LE: loop exit
PB: predicated region body
PF: predicated region fallthrough
CT: control target
= control target key end

     0   :  { %9 = vsyncpa [#allocation4], 0  ;;  %s294_s0 = inlined_call_operand.hbm [shape: f32[4,1024], index: 0, kind: input, shape index: {}]   ;;  %s295_s1 = inlined_call_operand.hbm [shape: f32[1,1024], index: 1, kind: input, shape index: {}]   ;;  %s296_s2 = inlined_call_operand.<no memory space> [shape: f32[1], index: 2, kind: input, shape index: {}]   ;;  %s297_s3 = inlined_call_operand.hbm [shape: f32[1,4], index: 3, kind: output, shape index: {}]  }
   0x1   :  { %10 = vsyncpa [#allocation7], 0 }
   0x2   :  { %11 = vsyncpa [#allocation5], 0  ;;  %s224_s12 = smov [#allocation3]   ;;  %s225_s14 = smov [#allocation6]  }
   0x3   :  { %s18_s13 = sshll.u32 %s224_s12, 4  ;;  %s28_s15 = sshll.u32 %s225_s14, 4  ;;  %s19_s13 = int_to_ptr.vmem [resolvable:$true] %s18_s13  ;;  %s29_s15 = int_to_ptr.vmem [resolvable:$true] %s28_s15 }
   0x4   :  { %s152_s18 = scalar_lea.hbm %s294_s0, 512 }
   0x5   :  { %p153_p0 = scmp.ne.s32.totalorder %s294_s0, %s152_s18  ;;  %p156_p1 = scmp.lt.u32.totalorder %s152_s18, %s294_s0 }
   0x7   :  { %p158_p2 = pnand %p156_p1, %p153_p0 }
   0x9   :  { %161 = shalt.err (!%p158_p2)
}
   0xa   :  { %s162_s23 = scalar_lea.vmem %s19_s13, 512  ;;  %p167_p4 = scmp.lt.s32.totalorder %s19_s13, %s19_s13 }
   0xb   :  { %p163_p3 = scmp.ne.s32.totalorder %s19_s13, %s162_s23  ;;  %p168_p5 = scmp.lt.s32.totalorder %s162_s23, %s162_s23 }
   0xd   :  { %p169_p6 = por %p168_p5, %p167_p4 }
   0xf   :  { %p170_p7 = pnand %p169_p6, %p163_p3 }
  0x11   :  { %173 = shalt.err (!%p170_p7)
}
  0x12   :  { %21 = dma.hbm_to_vmem [thread:$0]  %s294_s0, 512, %s19_s13, [#allocation4]  }
  0x13   :  { %s174_s28 = scalar_lea.hbm %s295_s1, 128 }
  0x14   :  { %p175_p8 = scmp.ne.s32.totalorder %s295_s1, %s174_s28  ;;  %p178_p9 = scmp.lt.u32.totalorder %s174_s28, %s295_s1 }
  0x16   :  { %p180_p10 = pnand %p178_p9, %p175_p8 }
  0x18   :  { %183 = shalt.err (!%p180_p10)
}
  0x19   :  { %s184_s6 = scalar_lea.vmem %s29_s15, 128  ;;  %p189_p12 = scmp.lt.s32.totalorder %s29_s15, %s29_s15 }
  0x1a   :  { %p185_p11 = scmp.ne.s32.totalorder %s29_s15, %s184_s6  ;;  %p190_p13 = scmp.lt.s32.totalorder %s184_s6, %s184_s6 }
  0x1c   :  { %p191_p0 = por %p190_p13, %p189_p12 }
  0x1e   :  { %p192_p1 = pnand %p191_p0, %p185_p11 }
  0x20   :  { %195 = shalt.err (!%p192_p1)
}
  0x21   :  { %31 = dma.hbm_to_vmem [thread:$0]  %s295_s1, 128, %s29_s15, [#allocation7]  }
  0x22   :  { %218 = dma.done.wait [#allocation4], 512  }
  0x23   :  { %219 = vsyncadd [#allocation4], 4294966784 }
  0x24   :  { %220 = dma.done.wait [#allocation7], 128  }
  0x25   :  { %221 = vsyncadd [#allocation7], 4294967168  ;;  %v46_v0 = vlaneseq  ;;  %v44_v10 = vld [vmem:[#allocation6] sm:$0xff]  ;;  %v41_v16 = vld [vmem:[#allocation3 + $0x8] sm:$0xff]  ;;  %vm102_vm0 = vcmask 1043456   ;;  %v121_v52 = vstv %s296_s2  ;;  %s226_s9 = smov [#allocation8]  }
  0x26   :  { %v40_v15 = vld [vmem:[#allocation3] sm:$0xff]  ;;  %v42_v23 = vld [vmem:[#allocation3 + $0x10] sm:$0xff]  ;;  %v43_v32 = vld [vmem:[#allocation3 + $0x18] sm:$0xff]  ;;  %s139_s10 = sshll.u32 %s226_s9, 4  ;;  %vm131_vm1 = vcmask 24576   ;;  %s140_s10 = int_to_ptr.vmem [resolvable:$true] %s139_s10 }
  0x27   :  { %v47_v1 = vshrl.u32 %v46_v0, 7  ;;  %v125_v50 = vand.u32 127, %v46_v0  ;;  %s196_s11 = scalar_lea.vmem %s140_s10, 16  ;;  %s200_s12 = scalar_lea.vmem %s140_s10, 32 }
  0x28   :  { %p197_p2 = scmp.ne.s32.totalorder %s140_s10, %s196_s11  ;;  %p201_p3 = scmp.lt.s32.totalorder %s140_s10, %s140_s10 }
  0x29   :  { %v48_v2 = vsub.s32 0, %v47_v1  ;;  %v52_v3 = vsub.s32 1, %v47_v1  ;;  %v56_v4 = vsub.s32 2, %v47_v1  ;;  %v60_v5 = vsub.s32 3, %v47_v1  ;;  %p202_p4 = scmp.lt.s32.totalorder %s200_s12, %s196_s11 }
  0x2a   :  { %v64_v6 = vsub.s32 4, %v47_v1  ;;  %v68_v7 = vsub.s32 5, %v47_v1  ;;  %v72_v8 = vsub.s32 6, %v47_v1  ;;  %v76_v9 = vsub.s32 7, %v47_v1 }
  0x2b   :  { %v49_v11 = vrot.slane %v44_v10, %v48_v2  ;;  %v53_v12 = vrot.slane %v44_v10, %v52_v3  ;;  %v57_v13 = vrot.slane %v44_v10, %v56_v4  ;;  %v61_v14 = vrot.slane %v44_v10, %v60_v5  ;;  %p203_p5 = por %p202_p4, %p201_p3 }
  0x2c   :  { %v65_v17 = vrot.slane %v44_v10, %v64_v6  ;;  %v69_v18 = vrot.slane %v44_v10, %v68_v7  ;;  %v73_v19 = vrot.slane %v44_v10, %v72_v8  ;;  %v77_v20 = vrot.slane %v44_v10, %v76_v9 }
  0x2d   :  { %v78_v21 = vcombine.low %v49_v11, %v53_v12  ;;  %v79_v22 = vcombine.low %v57_v13, %v61_v14  ;;  %v128_v51 = vsub.s32 %v125_v50, %v47_v1  ;;  %p204_p6 = pnand %p203_p5, %p197_p2 }
  0x2e   :  { %v80_v24 = vcombine.low %v65_v17, %v69_v18  ;;  %v81_v27 = vcombine.low %v73_v19, %v77_v20 }
  0x2f   :  { %v86_v25 = vmul.f32 %v78_v21, %v40_v15  ;;  %v87_v26 = vmul.f32 %v79_v22, %v41_v16 }
  0x30   :  { %v88_v28 = vmul.f32 %v80_v24, %v42_v23  ;;  %v89_v36 = vmul.f32 %v81_v27, %v43_v32 }
  0x31   :  { %v94_v29 = vcombine.high %v86_v25, %v86_v25  ;;  %v95_v30 = vcombine.high %v87_v26, %v87_v26  ;;  %v103_v31 = vsel %vm102_vm0, %v86_v25, 0.0  ;;  %v106_v34 = vsel %vm102_vm0, %v87_v26, 0.0 }
  0x32   :  { %v96_v37 = vcombine.high %v88_v28, %v88_v28  ;;  %v110_v40 = vsel %vm102_vm0, %v88_v28, 0.0  ;;  %v97_v42 = vcombine.high %v89_v36, %v89_v36  ;;  %v114_v45 = vsel %vm102_vm0, %v89_v36, 0.0 }
  0x33   :  { %v104_v33 = vsel %vm102_vm0, %v94_v29, 0.0  ;;  %v108_v38 = vsel %vm102_vm0, %v95_v30, 0.0 }
  0x34   :  { %v105_v35 = vadd.f32 %v104_v33, %v103_v31  ;;  %v112_v43 = vsel %vm102_vm0, %v96_v37, 0.0  ;;  %v116_v47 = vsel %vm102_vm0, %v97_v42, 0.0 }
  0x36   :  { %v107_v39 = vadd.f32 %v106_v34, %v105_v35 }
  0x38   :  { %v109_v41 = vadd.f32 %v108_v38, %v107_v39 }
  0x3a   :  { %v111_v44 = vadd.f32 %v110_v40, %v109_v41 }
  0x3c   :  { %v113_v46 = vadd.f32 %v112_v43, %v111_v44 }
  0x3e   :  { %v115_v48 = vadd.f32 %v114_v45, %v113_v46 }
  0x40   :  { %v117_v49 = vadd.f32 %v116_v47, %v115_v48 }
  0x42   :  { %118 = vadd.xlane.f32.xlu0 %v117_v49 }
  0xcf   :  { %v119_v53 = vpop.xlane.xlu0 %118 }
  0xd0   :  { %v122_v54 = vadd.f32 %v121_v52, %v119_v53 }
  0xd2   :  { %v129_v55 = vrot.slane %v122_v54, %v128_v51 }
  0xd4   :  { %132 = vst.msk [vmem:[#allocation8] sm:$0x1] %vm131_vm1, %v129_v55 }
  0xd5   :  { %207 = shalt.err (!%p204_p6)
}
  0xd6   :  { %s208_s2 = scalar_lea.hbm %s297_s3, 16 }
  0xd7   :  { %p209_p7 = scmp.ne.s32.totalorder %s297_s3, %s208_s2  ;;  %p212_p8 = scmp.lt.u32.totalorder %s208_s2, %s297_s3 }
  0xd9   :  { %p214_p9 = pnand %p212_p8, %p209_p7 }
  0xdb   :  { %217 = shalt.err (!%p214_p9)
}
  0xdc   :  { %142 = dma.vmem_to_hbm [thread:$0]  %s140_s10, 16, %s297_s3, [#allocation5]  }
  0xdd   :  { %222 = dma.done.wait [#allocation5], 16  }
  0xde   :  { %223 = vsyncadd [#allocation5], 4294967280 }
  0xdf   :  { %146 = vsyncpa [#allocation4], 1 }
  0xe0   :  { %147 = vsyncpa [#allocation7], 1 }
  0xe1   :  { %148 = vsyncpa [#allocation5], 1 }

</bundles_post_ra>
